<compile_context>
chip_gen: v7x
topology: tpu7x:2x2x1
jax: 0.10.0
libtpu: 0.0.40
codegen_flags: <defaults>
</compile_context>

<pallas_src>
import functools

import jax
import jax.numpy as jnp
from jax.experimental import pallas as pl
from jax.experimental.pallas import tpu as pltpu

LANE = 128
TARGET_BLOCK_BYTES = 8 * 1024 * 1024   # both input streams combined, per pipeline buffer
MIN_SPLIT_ROWS = 2048                  # >=1 MiB/input in f32: worth 2 blocks for v7x megacore


def _dice_partial_kernel(pred_ref, targ_ref, out_ref, *,
                         need_row_mask, valid_rows_last):
    """One grid step: partial sums of one (block_rows, 128) tile -> SMEM (1, 2)."""
    p = jax.nn.sigmoid(pred_ref[...].astype(jnp.float32))
    t = targ_ref[...].astype(jnp.float32)

    def write_sums(pv, tv):
        out_ref[0, 0] = jnp.sum(pv * tv)   # sum(sigmoid(pred) * target)
        out_ref[0, 1] = jnp.sum(pv + tv)   # sum(sigmoid(pred)) + sum(target)

    if need_row_mask:
        # Only the last block over-reads past the array; every other step takes
        # the mask-free branch.  valid_rows_last is a static Python int, so the
        # compare is against a constant iota (no per-element index arithmetic,
        # no int32 overflow hazard).
        is_last = pl.program_id(0) == (pl.num_programs(0) - 1)

        @pl.when(jnp.logical_not(is_last))
        def _():
            write_sums(p, t)

        @pl.when(is_last)
        def _():
            row = jax.lax.broadcasted_iota(jnp.int32, p.shape, 0)
            valid = row < valid_rows_last
            # where() (not multiply) so garbage NaN/Inf from the over-read
            # cannot leak into the sums.
            write_sums(jnp.where(valid, p, 0.0), jnp.where(valid, t, 0.0))
    else:
        write_sums(p, t)


def dice_loss(prediction, target, smooth=1e-08, max_block_rows=None):
    """Pallas TPU implementation of DiceLoss.forward (returns a scalar)."""
    assert prediction.shape == target.shape
    n = prediction.size

    pred_flat = prediction.reshape(-1)   # original dtype kept; cast in-kernel
    targ_flat = target.reshape(-1)

    # Ragged (<128 element) tail handled with plain jnp in the wrapper: no
    # full-tensor jnp.pad copy, no in-kernel lane masking.
    n_main = (n // LANE) * LANE
    if n_main != n:
        tail_p = jax.nn.sigmoid(pred_flat[n_main:].astype(jnp.float32))
        tail_t = targ_flat[n_main:].astype(jnp.float32)
        tail_pt = jnp.sum(tail_p * tail_t)
        tail_sum = jnp.sum(tail_p) + jnp.sum(tail_t)
        pred_flat = pred_flat[:n_main]
        targ_flat = targ_flat[:n_main]
    else:
        tail_pt = jnp.float32(0.0)
        tail_sum = jnp.float32(0.0)

    if n_main == 0:
        sum_pt = tail_pt
        sum_p_plus_t = tail_sum
    else:
        rows = n_main // LANE
        pred_2d = pred_flat.reshape(rows, LANE)
        targ_2d = targ_flat.reshape(rows, LANE)

        # Dtype-aware block size: ~TARGET_BLOCK_BYTES of input per pipeline
        # buffer (8192 rows f32+f32, 16384 rows bf16+bf16), rounded to a
        # multiple of 512 rows.  Double-buffered = ~16 MiB VMEM.
        p_item = jnp.dtype(prediction.dtype).itemsize
        t_item = jnp.dtype(target.dtype).itemsize
        row_align = 32 // min(p_item, t_item)          # 8 (f32), 16 (bf16), 32 (i8)
        cap = max(512, (TARGET_BLOCK_BYTES // (LANE * (p_item + t_item))) // 512 * 512)
        if max_block_rows is not None:
            cap = max(row_align, (min(cap, max_block_rows) // row_align) * row_align)

        if rows > cap:
            block_rows = cap
        elif rows >= MIN_SPLIT_ROWS:
            # Keep >= 2 grid steps so the "parallel" axis can be split across
            # v7x's two TensorCores (no-op on v5e/v6e).
            block_rows = ((pl.cdiv(rows, 2) + row_align - 1) // row_align) * row_align
        else:
            block_rows = rows      # single full-dim block (always a legal shape)

        grid = pl.cdiv(rows, block_rows)
        valid_rows_last = rows - (grid - 1) * block_rows
        need_row_mask = valid_rows_last != block_rows

        in_spec = pl.BlockSpec((block_rows, LANE), lambda i: (i, 0))

        partials = pl.pallas_call(
            functools.partial(_dice_partial_kernel,
                              need_row_mask=need_row_mask,
                              valid_rows_last=valid_rows_last),
            out_shape=jax.ShapeDtypeStruct((grid, 2), jnp.float32),
            grid_spec=pltpu.PrefetchScalarGridSpec(
                num_scalar_prefetch=0,
                grid=(grid,),
                in_specs=[in_spec, in_spec],
                out_specs=pl.BlockSpec((1, 2), lambda i: (i, 0),
                                       memory_space=pltpu.SMEM),
            ),
            compiler_params=pltpu.CompilerParams(
                dimension_semantics=("parallel",),   # independent blocks -> megacore
                vmem_limit_bytes=32 << 20,           # fits v5e default era & v7x physical
            ),
        )(pred_2d, targ_2d)

        sums = jnp.sum(partials, axis=0)             # tiny wrapper-side combine
        sum_pt = sums[0] + tail_pt
        sum_p_plus_t = sums[1] + tail_sum

    intersection = 2.0 * sum_pt + smooth
    union = sum_p_plus_t + smooth
    return 1.0 - intersection / union


def dice_loss_ref(prediction, target, smooth=1e-08):
    p = jax.nn.sigmoid(prediction.astype(jnp.float32))
    t = target.astype(jnp.float32)
    intersection = 2.0 * jnp.sum(p * t) + smooth
    union = jnp.sum(p) + jnp.sum(t) + smooth
    return 1.0 - intersection / union


if __name__ == "__main__":
    key = jax.random.PRNGKey(0)
    kp, kt, kp2, kt2, kp3, kt3 = jax.random.split(key, 6)

    # 1) NCHW input, same convention as the PyTorch module (aligned, 1 block).
    B, C, H, W = 2, 4, 16, 16
    prediction = jax.random.normal(kp, (B, C, H, W), dtype=jnp.float32)
    target = (jax.random.uniform(kt, (B, C, H, W)) > 0.5).astype(jnp.float32)
    loss = jax.block_until_ready(dice_loss(prediction, target))
    ref = jax.block_until_ready(dice_loss_ref(prediction, target))
    assert jnp.allclose(loss, ref, rtol=1e-5, atol=1e-6), (loss, ref)

    # 2) Ragged element count + forced multi-block grid with a partial last
    #    block: exercises the wrapper tail path and the last-block row mask.
    pred2 = jax.random.normal(kp2, (1, 3, 41, 31), dtype=jnp.float32)   # 3813 elems
    targ2 = (jax.random.uniform(kt2, (1, 3, 41, 31)) > 0.5).astype(jnp.float32)
    loss2 = jax.block_until_ready(dice_loss(pred2, targ2, max_block_rows=8))
    ref2 = jax.block_until_ready(dice_loss_ref(pred2, targ2))
    assert jnp.allclose(loss2, ref2, rtol=1e-5, atol=1e-6), (loss2, ref2)

    # 3) bf16 inputs (cast to f32 in-kernel).
    pred3 = jax.random.normal(kp3, (B, C, H, W), dtype=jnp.bfloat16)
    targ3 = (jax.random.uniform(kt3, (B, C, H, W)) > 0.5).astype(jnp.bfloat16)
    loss3 = jax.block_until_ready(dice_loss(pred3, targ3))
    ref3 = jax.block_until_ready(dice_loss_ref(pred3, targ3))
    assert jnp.allclose(loss3, ref3, rtol=1e-4, atol=1e-5), (loss3, ref3)

    print("KERNEL_OK")
</pallas_src>

<mosaic_0001>
module attributes {stable_mosaic.version = 11 : i64} {
  func.func @_dice_partial_kernel(%arg0: i32, %arg1: memref<16x128xf32, #tpu.memory_space<vmem>>, %arg2: memref<16x128xf32, #tpu.memory_space<vmem>>, %arg3: memref<1x2xf32, #tpu.memory_space<smem>>) attributes {dimension_semantics = [#tpu.dimension_semantics<parallel>], iteration_bounds = array<i64: 1>, scalar_prefetch = 0 : i64, scratch_operands = 0 : i64, tpu.core_type = #tpu.core_type<tc>, window_params = [{transform_indices = @transform_0, window_bounds = array<i64: 16, 128>}, {transform_indices = @transform_1, window_bounds = array<i64: 16, 128>}, {transform_indices = @transform_2, window_bounds = array<i64: 1, 2>}]} {
    %c0 = arith.constant 0 : index
    %c0_0 = arith.constant 0 : index
    %0 = vector.load %arg1[%c0, %c0_0] : memref<16x128xf32, #tpu.memory_space<vmem>>, vector<16x128xf32>
    %1 = arith.negf %0 : vector<16x128xf32>
    %2 = math.exp %1 : vector<16x128xf32>
    %cst = arith.constant 1.000000e+00 : f32
    %3 = vector.broadcast %cst : f32 to vector<16x128xf32>
    %4 = arith.addf %3, %2 : vector<16x128xf32>
    %5 = arith.divf %3, %4 : vector<16x128xf32>
    %c0_1 = arith.constant 0 : index
    %c0_2 = arith.constant 0 : index
    %6 = vector.load %arg2[%c0_1, %c0_2] : memref<16x128xf32, #tpu.memory_space<vmem>>, vector<16x128xf32>
    %7 = arith.mulf %5, %6 : vector<16x128xf32>
    %8 = vector.shape_cast %7 : vector<16x128xf32> to vector<1x16x128xf32>
    %cst_3 = arith.constant dense<0.000000e+00> : vector<1xf32>
    %9 = vector.multi_reduction <add>, %8, %cst_3 [1, 2] : vector<1x16x128xf32> to vector<1xf32>
    %10 = vector.shape_cast %9 : vector<1xf32> to vector<1x1x1xf32>
    %11 = vector.extract %10[0, 0, 0] : f32 from vector<1x1x1xf32>
    %c0_4 = arith.constant 0 : index
    %c0_5 = arith.constant 0 : index
    %12 = memref.load %arg3[%c0_4, %c0_5] : memref<1x2xf32, #tpu.memory_space<smem>>
    memref.store %11, %arg3[%c0_4, %c0_5] : memref<1x2xf32, #tpu.memory_space<smem>>
    %13 = arith.addf %5, %6 : vector<16x128xf32>
    %14 = vector.shape_cast %13 : vector<16x128xf32> to vector<1x16x128xf32>
    %cst_6 = arith.constant dense<0.000000e+00> : vector<1xf32>
    %15 = vector.multi_reduction <add>, %14, %cst_6 [1, 2] : vector<1x16x128xf32> to vector<1xf32>
    %16 = vector.shape_cast %15 : vector<1xf32> to vector<1x1x1xf32>
    %17 = vector.extract %16[0, 0, 0] : f32 from vector<1x1x1xf32>
    %c0_7 = arith.constant 0 : index
    %c1 = arith.constant 1 : index
    %18 = memref.load %arg3[%c0_7, %c1] : memref<1x2xf32, #tpu.memory_space<smem>>
    memref.store %17, %arg3[%c0_7, %c1] : memref<1x2xf32, #tpu.memory_space<smem>>
    return
  }
  func.func @transform_0(%arg0: i32) -> (i32, i32) {
    %c0_i32 = arith.constant 0 : i32
    %c0_i32_0 = arith.constant 0 : i32
    return %arg0, %c0_i32 : i32, i32
  }
  func.func @transform_1(%arg0: i32) -> (i32, i32) {
    %c0_i32 = arith.constant 0 : i32
    %c0_i32_0 = arith.constant 0 : i32
    return %arg0, %c0_i32 : i32, i32
  }
  func.func @transform_2(%arg0: i32) -> (i32, i32) {
    %c0_i32 = arith.constant 0 : i32
    %c0_i32_0 = arith.constant 0 : i32
    return %arg0, %c0_i32 : i32, i32
  }
}

</mosaic_0001>

<bundles_post_ra>
// kernel: tpu_custom_call.1
= control target key start
LH: loop header
LB: loop body
LE: loop exit
PB: predicated region body
PF: predicated region fallthrough
CT: control target
= control target key end

     0   :  { %7 = vsyncpa [#allocation3], 0  ;;  %s234_s0 = inlined_call_operand.hbm [shape: f32[16,128], index: 0, kind: input, shape index: {}]   ;;  %s235_s1 = inlined_call_operand.hbm [shape: f32[16,128], index: 1, kind: input, shape index: {}]   ;;  %s236_s2 = inlined_call_operand.hbm [shape: f32[1,2], index: 2, kind: output, shape index: {}]  }
   0x1   :  { %8 = vsyncpa [#allocation6], 0 }
   0x2   :  { %9 = vsyncpa [#allocation4], 0  ;;  %s178_s9 = smov [#allocation2]   ;;  %s118_s13 = scalar_lea.hbm %s234_s0, 256 }
   0x3   :  { %s15_s10 = sshll.u32 %s178_s9, 4  ;;  %p119_p0 = scmp.ne.s32.totalorder %s234_s0, %s118_s13  ;;  %s16_s10 = int_to_ptr.vmem [resolvable:$true] %s15_s10 }
   0x4   :  { %p122_p1 = scmp.lt.u32.totalorder %s118_s13, %s234_s0 }
   0x6   :  { %p124_p2 = pnand %p122_p1, %p119_p0 }
   0x8   :  { %127 = shalt.err (!%p124_p2)
}
   0x9   :  { %s128_s18 = scalar_lea.vmem %s16_s10, 256  ;;  %p133_p4 = scmp.lt.s32.totalorder %s16_s10, %s16_s10 }
   0xa   :  { %p129_p3 = scmp.ne.s32.totalorder %s16_s10, %s128_s18  ;;  %p134_p5 = scmp.lt.s32.totalorder %s128_s18, %s128_s18 }
   0xc   :  { %p135_p6 = por %p134_p5, %p133_p4 }
   0xe   :  { %p136_p7 = pnand %p135_p6, %p129_p3 }
  0x10   :  { %139 = shalt.err (!%p136_p7)
}
  0x11   :  { %s179_s19 = smov 128   ;;  %s180_s20 = smov 8  }
  0x12   :  { %21 = dma.hbm_to_vmem [thread:$0]  %s234_s0, 256, %s16_s10, [#allocation3], %s179_s19, %s179_s19, %s180_s20  }
  0x13   :  { %s181_s23 = smov [#allocation5]   ;;  %s140_s27 = scalar_lea.hbm %s235_s1, 256 }
  0x14   :  { %s27_s24 = sshll.u32 %s181_s23, 4  ;;  %p141_p8 = scmp.ne.s32.totalorder %s235_s1, %s140_s27  ;;  %s28_s24 = int_to_ptr.vmem [resolvable:$true] %s27_s24 }
  0x15   :  { %p144_p9 = scmp.lt.u32.totalorder %s140_s27, %s235_s1 }
  0x17   :  { %p146_p10 = pnand %p144_p9, %p141_p8 }
  0x19   :  { %149 = shalt.err (!%p146_p10)
}
  0x1a   :  { %s150_s4 = scalar_lea.vmem %s28_s24, 256  ;;  %p155_p12 = scmp.lt.s32.totalorder %s28_s24, %s28_s24 }
  0x1b   :  { %p151_p11 = scmp.ne.s32.totalorder %s28_s24, %s150_s4  ;;  %p156_p13 = scmp.lt.s32.totalorder %s150_s4, %s150_s4 }
  0x1d   :  { %p157_p0 = por %p156_p13, %p155_p12 }
  0x1f   :  { %p158_p1 = pnand %p157_p0, %p151_p11 }
  0x21   :  { %161 = shalt.err (!%p158_p1)
}
  0x22   :  { %33 = dma.hbm_to_vmem [thread:$0]  %s235_s1, 256, %s28_s24, [#allocation6], %s179_s19, %s179_s19, %s180_s20  }
  0x23   :  { %172 = dma.done.wait [#allocation3], 256  }
  0x24   :  { %173 = vsyncadd [#allocation3], 4294967040 }
  0x25   :  { %174 = dma.done.wait [#allocation6], 256  }
  0x26   :  { %175 = vsyncadd [#allocation6], 4294967040  ;;  %v40_v0 = vld [vmem:[#allocation2] sm:$0xff]  ;;  %v41_v1 = vld [vmem:[#allocation2 + $0x8] sm:$0xff]  ;;  %s162_s9 = scalar_lea.hbm %s236_s2, 16 }
  0x27   :  { %v99_v2 = vmul.f32 -1.442695, %v40_v0  ;;  %v100_v3 = vmul.f32 -1.442695, %v41_v1  ;;  %v54_v8 = vld [vmem:[#allocation5] sm:$0xff]  ;;  %v55_v9 = vld [vmem:[#allocation5 + $0x8] sm:$0xff]  ;;  %p163_p2 = scmp.ne.s32.totalorder %s236_s2, %s162_s9  ;;  %p166_p3 = scmp.lt.u32.totalorder %s162_s9, %s236_s2 }
  0x29   :  { %110 = vpow2.f32 %v99_v2  ;;  %p168_p4 = pnand %p166_p3, %p163_p2 }
  0x2a   :  { %112 = vpow2.f32 %v100_v3 }
  0x33   :  { %v111_v4 = vpop.eup %110 }
  0x34   :  { %v113_v5 = vpop.eup %112  ;;  %v48_v6 = vadd.f32 1.0, %v111_v4 }
  0x35   :  { %v49_v7 = vadd.f32 1.0, %v113_v5 }
  0x36   :  { %114 = vrcp.f32 %v48_v6 }
  0x37   :  { %116 = vrcp.f32 %v49_v7 }
  0x40   :  { %v115_v10 = vpop.eup %114 }
  0x41   :  { %v117_v11 = vpop.eup %116  ;;  %v56_v12 = vmul.f32 %v115_v10, %v54_v8  ;;  %v70_v14 = vadd.f32 %v115_v10, %v54_v8 }
  0x42   :  { %v57_v13 = vmul.f32 %v117_v11, %v55_v9  ;;  %v71_v15 = vadd.f32 %v117_v11, %v55_v9 }
  0x44   :  { %v58_v16 = vadd.f32 %v57_v13, %v56_v12  ;;  %v72_v17 = vadd.f32 %v71_v15, %v70_v14 }
  0x46   :  { %59 = vadd.xlane.f32.xlu0 %v58_v16 }
  0x4a   :  { %73 = vadd.xlane.f32.xlu0 %v72_v17 }
  0xd3   :  { %v60_v18 = vpop.xlane.xlu0 %59 }
  0xd4   :  { %v61_v19 = vrot.slane %v60_v18, 4 }
  0xd6   :  { %v62_v20 = vadd.f32 %v61_v19, %v60_v18 }
  0xd7   :  { %v74_v21 = vpop.xlane.xlu0 %73 }
  0xd8   :  { %v63_v22 = vrot.slane %v62_v20, 2  ;;  %v75_v23 = vrot.slane %v74_v21, 4 }
  0xda   :  { %v76_v24 = vadd.f32 %v75_v23, %v74_v21  ;;  %v64_v25 = vadd.f32 %v63_v22, %v62_v20 }
  0xdc   :  { %v77_v26 = vrot.slane %v76_v24, 2  ;;  %v65_v27 = vrot.slane %v64_v25, 1 }
  0xde   :  { %v78_v28 = vadd.f32 %v77_v26, %v76_v24  ;;  %v66_v29 = vadd.f32 %v65_v27, %v64_v25 }
  0xe0   :  { %101 = vpush %v66_v29  ;;  %v79_v30 = vrot.slane %v78_v28, 1 }
  0xe2   :  { %v80_v31 = vadd.f32 %v79_v30, %v78_v28 }
  0xe4   :  { %103 = vpush %v80_v31 }
 0x111   :  { %s102_s1 = spop %101 }
 0x112   :  { %69 = sst [smem:[#allocation7]] %s102_s1 }
 0x115   :  { %s104_s6 = spop %103 }
 0x116   :  { %83 = sst [smem:[#allocation7 + $0x1]] %s104_s6 }
 0x117   :  { %171 = shalt.err (!%p168_p4)
}
 0x118   :  { %s182_s14 = smov [#allocation7]  }
 0x119   :  { %91 = dma.smem_to_hbm %s182_s14, 16, %s236_s2, [#allocation4]  }
 0x11a   :  { %176 = dma.done.wait [#allocation4], 16  }
 0x11b   :  { %177 = vsyncadd [#allocation4], 4294967280 }
 0x11c   :  { %95 = sfence }
 0x11d   :  { %96 = vsyncpa [#allocation3], 1 }
 0x11e   :  { %97 = vsyncpa [#allocation6], 1 }
 0x11f   :  { %98 = vsyncpa [#allocation4], 1 }

</bundles_post_ra>
